<compile_context>
chip_gen: v6e
topology: v6e:2x2x1
jax: 0.10.0
libtpu: 0.0.40
codegen_flags: <defaults>
</compile_context>

<pallas_src>
import math
from functools import partial

import numpy as np
import jax
import jax.numpy as jnp
from jax import lax
from jax.experimental import pallas as pl
from jax.experimental.pallas import tpu as pltpu  # noqa: F401  (TPU backend)

CONTEXT_LEN = 32
HORIZON = 1
RMS_EPS = 1.1920929e-07  # torch.finfo(float32).eps (F.rms_norm default)


# ----------------------------------------------------------------------------
# Fused Pallas kernel: entire forward in one grid step, all batches & heads.
# ----------------------------------------------------------------------------
def _fused_attention_kernel(x_ref, wext_ref, wo_ref, cos_ref, sin_ref,
                            hmean_ref, rowmask_ref, smask_ref, o_ref,
                            *, n_head, head_dim):
    H, D = n_head, head_dim
    N, C = x_ref.shape                      # N = B*T rows, C = n_emb
    C2 = 2 * C

    x = x_ref[...]                          # (N, C)
    w_ext = wext_ref[...]                   # (C, 5C) = [Wq^T|Wk^T|Wq^T@rot|Wk^T@rot|Wv^T]
    w_o = wo_ref[...]                       # (C, C)   pre-transposed
    cos2 = cos_ref[...]                     # (N, 2C)
    sin2 = sin_ref[...]                     # (N, 2C)
    hmean2 = hmean_ref[...]                 # (2C, 2C) block-diag mean-of-squares
    rowmask2 = rowmask_ref[...]             # (H*N, 2C) block-diag head selector
    smask = smask_ref[...]                  # (N, H*N) causal & same-batch 0/1 mask

    # 1) fused projection: q, k, rotate_half(q), rotate_half(k), v in one matmul
    proj = jnp.dot(x, w_ext, preferred_element_type=jnp.float32)      # (N, 5C)
    qk = proj[:, 0:C2]                                                 # [q | k]
    qk_rot = proj[:, C2:2 * C2]                                        # [q_rot | k_rot]
    v = proj[:, 2 * C2:2 * C2 + C]                                     # (N, C)

    # 2) RoPE on the packed [q | k] slab: pure VPU (rotate_half pre-folded)
    qk = qk * cos2 + qk_rot * sin2                                     # (N, 2C)

    # 3) per-head RMSNorm for q & k via ONE block-diag matmul; the 1/sqrt(D)
    #    score scale is folded into the q half (sum-of-squares + D*eps).
    ms = jnp.dot(qk * qk, hmean2, preferred_element_type=jnp.float32)  # (N, 2C)
    q = qk[:, :C] * lax.rsqrt(ms[:, :C] + D * RMS_EPS)                 # (N, C) (already /sqrt(D))
    k = qk[:, C:] * lax.rsqrt(ms[:, C:] + RMS_EPS)                     # (N, C)

    # 4) head-packed attention: block-diagonal K and [V | 1] slabs built by
    #    sublane replication + 0/1 mask (no per-head loop, no tiny matmuls)
    rowmask = rowmask2[:, :C]                                          # (H*N, C)
    k_exp = jnp.concatenate([k] * H, axis=0) * rowmask                 # (H*N, C)
    v_aug = jnp.concatenate([v, jnp.ones_like(v)], axis=1)             # (N, 2C)
    vd_exp = jnp.concatenate([v_aug] * H, axis=0) * rowmask2           # (H*N, 2C)

    # all-head scores: s[i, h*N + j] = <q_h[i], k_h[j]> / sqrt(D)
    s = lax.dot_general(q, k_exp, (((1,), (1,)), ((), ())),
                        preferred_element_type=jnp.float32)            # (N, H*N)

    # softmax without max-subtraction (|s| <= sqrt(D) after RMSNorm + scale)
    p = jnp.exp(s) * smask                                             # (N, H*N)

    # one matmul yields the head-merged context AND the per-head softmax denom
    od = jnp.dot(p, vd_exp, preferred_element_type=jnp.float32)        # (N, 2C)
    o = od[:, :C] * pl.reciprocal(od[:, C:], approx=True)              # (N, C)

    # 5) output projection, lane-dense (N, C) store
    o_ref[...] = jnp.dot(o, w_o, preferred_element_type=jnp.float32).astype(o_ref.dtype)


def optimized_attention_forward(x, consts, n_head):
    """Eval-mode forward (no KV cache, dropout = 0). Single fused pallas_call."""
    w_ext, w_o_t, cos2, sin2, hmean2, rowmask2, smask = consts
    B, T, C = x.shape
    N = B * T
    D = C // n_head
    x2 = x.reshape(N, C)                    # fold batch into rows (free reshape)
    kernel = partial(_fused_attention_kernel, n_head=n_head, head_dim=D)
    out2 = pl.pallas_call(
        kernel,
        out_shape=jax.ShapeDtypeStruct((N, C), x.dtype),
        grid=(1,),                          # single step: v5e/v6e have one TC and
        in_specs=[                          # per-TC work here is << 1 us anyway
            pl.BlockSpec((N, C), lambda i: (0, 0)),               # x (B*T, C)
            pl.BlockSpec((C, 5 * C), lambda i: (0, 0)),           # W_ext
            pl.BlockSpec((C, C), lambda i: (0, 0)),               # W_o^T
            pl.BlockSpec((N, 2 * C), lambda i: (0, 0)),           # cos
            pl.BlockSpec((N, 2 * C), lambda i: (0, 0)),           # sin
            pl.BlockSpec((2 * C, 2 * C), lambda i: (0, 0)),       # hmean2
            pl.BlockSpec((n_head * N, 2 * C), lambda i: (0, 0)),  # rowmask2
            pl.BlockSpec((N, n_head * N), lambda i: (0, 0)),      # smask
        ],
        out_specs=pl.BlockSpec((N, C), lambda i: (0, 0)),
    )(x2, w_ext, w_o_t, cos2, sin2, hmean2, rowmask2, smask)
    return out2.reshape(B, T, C)


# ----------------------------------------------------------------------------
# Host-side constant precomputation (done ONCE, outside the per-call path)
# ----------------------------------------------------------------------------
def make_constants(w_qkv, w_o, n_head, batch, seq_len):
    w_qkv = np.asarray(w_qkv, np.float32)   # (3C, C) torch nn.Linear layout
    w_o = np.asarray(w_o, np.float32)       # (C, C)
    C = w_o.shape[0]
    H, D = n_head, C // n_head
    B, T = batch, seq_len
    N = B * T

    # interleaved rotate_half as a signed permutation (block-diag over heads):
    #   out[2i] = -u[2i+1], out[2i+1] = u[2i]
    r = np.zeros((D, D), np.float32)
    even = np.arange(0, D, 2)
    r[even + 1, even] = -1.0
    r[even, even + 1] = 1.0
    rot = np.kron(np.eye(H, dtype=np.float32), r)                     # (C, C)

    wq_t = w_qkv[0:C, :].T
    wk_t = w_qkv[C:2 * C, :].T
    wv_t = w_qkv[2 * C:3 * C, :].T
    # rotate_half folded into the projection: columns = [q | k | q_rot | k_rot | v]
    w_ext = np.concatenate([wq_t, wk_t, wq_t @ rot, wk_t @ rot, wv_t], axis=1)
    w_o_t = w_o.T

    # RoPE tables tiled over batch rows, heads, and the packed [q | k] halves
    inv_freq = 1.0 / (10000.0 ** (np.arange(0, D, 2, dtype=np.float32) / D))
    t = np.arange(T, dtype=np.float32)
    freqs = np.einsum("i,j->ij", t, inv_freq)                         # (T, D/2)
    sin = np.repeat(np.sin(freqs), 2, axis=-1)                        # (T, D)
    cos = np.repeat(np.cos(freqs), 2, axis=-1)
    sin2 = np.tile(sin, (B, 2 * H))                                   # (N, 2C)
    cos2 = np.tile(cos, (B, 2 * H))

    # per-head mean-of-squares (block-diag); q half absorbs the 1/sqrt(D) scale
    # (sum instead of mean => rsqrt(sum + D*eps) == rsqrt(mean + eps) / sqrt(D))
    hmean2 = np.zeros((2 * C, 2 * C), np.float32)
    hmean2[:C, :C] = np.kron(np.eye(H, dtype=np.float32), np.ones((D, D), np.float32))
    hmean2[C:, C:] = np.kron(np.eye(H, dtype=np.float32),
                             np.full((D, D), 1.0 / D, np.float32))

    # head selector for the block-diag K / [V|1] expansion:
    #   rowmask2[h*N + j, half*C + c] = 1  iff  c // D == h
    head_of_row = np.arange(H * N) // N
    head_of_col = np.arange(C) // D
    rowmask = (head_of_row[:, None] == head_of_col[None, :]).astype(np.float32)
    rowmask2 = np.tile(rowmask, (1, 2))                               # (H*N, 2C)

    # causal & same-batch 0/1 mask over the head-packed score slab (N, H*N)
    i_idx = np.arange(N)
    j_idx = np.arange(H * N) % N
    same_batch = (i_idx[:, None] // T) == (j_idx[None, :] // T)
    causal = (j_idx[None, :] % T) <= (i_idx[:, None] % T)
    smask = (same_batch & causal).astype(np.float32)

    to_dev = lambda a: jnp.asarray(a, jnp.float32)
    return tuple(map(to_dev, (w_ext, w_o_t, cos2, sin2, hmean2, rowmask2, smask)))


def init_params(key, n_emb):
    k1, k2 = jax.random.split(key)
    # torch nn.Linear weight layout: (out_features, in_features)
    w_qkv = jax.random.normal(k1, (3 * n_emb, n_emb), jnp.float32) * 0.02
    w_o = jax.random.normal(k2, (n_emb, n_emb), jnp.float32) * 0.02
    return w_qkv, w_o


# ----------------------------------------------------------------------------
# Pure-JAX reference (mirrors the PyTorch forward) for verification
# ----------------------------------------------------------------------------
def reference_forward(x, w_qkv_t, w_o_t, n_head):
    B, T, C = x.shape
    D = C // n_head
    qkv = (x.reshape(B * T, C) @ w_qkv_t).reshape(B, T, 3, n_head, D)
    q = jnp.transpose(qkv[:, :, 0], (0, 2, 1, 3))   # (B, H, T, D)
    k = jnp.transpose(qkv[:, :, 1], (0, 2, 1, 3))
    v = jnp.transpose(qkv[:, :, 2], (0, 2, 1, 3))

    inv_freq = 1.0 / (10000.0 ** (jnp.arange(0, D, 2, dtype=jnp.float32) / D))
    t = jnp.arange(T, dtype=jnp.float32)
    freqs = jnp.einsum("i,j->ij", t, inv_freq)
    sin = jnp.repeat(jnp.sin(freqs), 2, axis=-1)
    cos = jnp.repeat(jnp.cos(freqs), 2, axis=-1)

    def rotate_half(u):
        u1, u2 = u[..., ::2], u[..., 1::2]
        return jnp.stack((-u2, u1), axis=-1).reshape(u.shape)

    def norm(u):
        return u * lax.rsqrt(jnp.mean(u * u, axis=-1, keepdims=True) + RMS_EPS)

    q = q * cos + rotate_half(q) * sin
    k = k * cos + rotate_half(k) * sin
    q, k = norm(q), norm(k)

    s = jnp.einsum("bhqd,bhkd->bhqk", q, k) / math.sqrt(D)
    mask = jnp.tril(jnp.ones((T, T), bool))
    s = jnp.where(mask, s, -jnp.inf)
    p = jax.nn.softmax(s, axis=-1)
    o = jnp.einsum("bhqk,bhkd->bhqd", p, v)
    o = jnp.transpose(o, (0, 2, 1, 3)).reshape(B, T, C)
    return o @ w_o_t


# ----------------------------------------------------------------------------
if __name__ == "__main__":
    B, T, n_emb, n_head = 2, 8, 32, 4        # T <= CONTEXT_LEN + HORIZON
    D = n_emb // n_head

    key = jax.random.PRNGKey(0)
    kx, kp = jax.random.split(key)
    x = jax.random.normal(kx, (B, T, n_emb), jnp.float32)
    w_qkv, w_o = init_params(kp, n_emb)

    # hoisted one-time preprocessing: extended/pre-transposed weights, RoPE
    # tables, block-diag RMS matrix, head-selector and causal/batch masks
    consts = make_constants(w_qkv, w_o, n_head, B, T)

    out = optimized_attention_forward(x, consts, n_head)
    out = jax.block_until_ready(out)

    assert out.shape == (B, T, n_emb)
    assert bool(jnp.all(jnp.isfinite(out)))

    ref = reference_forward(x, jnp.asarray(w_qkv).T, jnp.asarray(w_o).T, n_head)
    max_err = float(jnp.max(jnp.abs(out - ref)))
    assert jnp.allclose(out, ref, rtol=2e-2, atol=2e-3), f"max abs err {max_err}"

    print("KERNEL_OK")
</pallas_src>

<mosaic_0001>
module attributes {stable_mosaic.version = 11 : i64} {
  func.func @_fused_attention_kernel(%arg0: i32, %arg1: memref<16x32xf32, #tpu.memory_space<vmem>>, %arg2: memref<32x160xf32, #tpu.memory_space<vmem>>, %arg3: memref<32x32xf32, #tpu.memory_space<vmem>>, %arg4: memref<16x64xf32, #tpu.memory_space<vmem>>, %arg5: memref<16x64xf32, #tpu.memory_space<vmem>>, %arg6: memref<64x64xf32, #tpu.memory_space<vmem>>, %arg7: memref<64x64xf32, #tpu.memory_space<vmem>>, %arg8: memref<16x64xf32, #tpu.memory_space<vmem>>, %arg9: memref<16x32xf32, #tpu.memory_space<vmem>>) attributes {dimension_semantics = [#tpu.dimension_semantics<arbitrary>], iteration_bounds = array<i64: 1>, scalar_prefetch = 0 : i64, scratch_operands = 0 : i64, tpu.core_type = #tpu.core_type<tc>, window_params = [{pipeline_mode = #tpu.pipeline_mode<synchronous>, transform_indices = @transform_0, window_bounds = array<i64: 16, 32>}, {pipeline_mode = #tpu.pipeline_mode<synchronous>, transform_indices = @transform_1, window_bounds = array<i64: 32, 160>}, {pipeline_mode = #tpu.pipeline_mode<synchronous>, transform_indices = @transform_2, window_bounds = array<i64: 32, 32>}, {pipeline_mode = #tpu.pipeline_mode<synchronous>, transform_indices = @transform_3, window_bounds = array<i64: 16, 64>}, {pipeline_mode = #tpu.pipeline_mode<synchronous>, transform_indices = @transform_4, window_bounds = array<i64: 16, 64>}, {pipeline_mode = #tpu.pipeline_mode<synchronous>, transform_indices = @transform_5, window_bounds = array<i64: 64, 64>}, {pipeline_mode = #tpu.pipeline_mode<synchronous>, transform_indices = @transform_6, window_bounds = array<i64: 64, 64>}, {pipeline_mode = #tpu.pipeline_mode<synchronous>, transform_indices = @transform_7, window_bounds = array<i64: 16, 64>}, {pipeline_mode = #tpu.pipeline_mode<synchronous>, transform_indices = @transform_8, window_bounds = array<i64: 16, 32>}]} {
    %c0 = arith.constant 0 : index
    %c0_0 = arith.constant 0 : index
    %0 = vector.load %arg1[%c0, %c0_0] : memref<16x32xf32, #tpu.memory_space<vmem>>, vector<16x32xf32>
    %c0_1 = arith.constant 0 : index
    %c0_2 = arith.constant 0 : index
    %1 = vector.load %arg2[%c0_1, %c0_2] : memref<32x160xf32, #tpu.memory_space<vmem>>, vector<32x160xf32>
    %c0_3 = arith.constant 0 : index
    %c0_4 = arith.constant 0 : index
    %2 = vector.load %arg3[%c0_3, %c0_4] : memref<32x32xf32, #tpu.memory_space<vmem>>, vector<32x32xf32>
    %c0_5 = arith.constant 0 : index
    %c0_6 = arith.constant 0 : index
    %3 = vector.load %arg4[%c0_5, %c0_6] : memref<16x64xf32, #tpu.memory_space<vmem>>, vector<16x64xf32>
    %c0_7 = arith.constant 0 : index
    %c0_8 = arith.constant 0 : index
    %4 = vector.load %arg5[%c0_7, %c0_8] : memref<16x64xf32, #tpu.memory_space<vmem>>, vector<16x64xf32>
    %c0_9 = arith.constant 0 : index
    %c0_10 = arith.constant 0 : index
    %5 = vector.load %arg6[%c0_9, %c0_10] : memref<64x64xf32, #tpu.memory_space<vmem>>, vector<64x64xf32>
    %c0_11 = arith.constant 0 : index
    %c0_12 = arith.constant 0 : index
    %6 = vector.load %arg7[%c0_11, %c0_12] : memref<64x64xf32, #tpu.memory_space<vmem>>, vector<64x64xf32>
    %c0_13 = arith.constant 0 : index
    %c0_14 = arith.constant 0 : index
    %7 = vector.load %arg8[%c0_13, %c0_14] : memref<16x64xf32, #tpu.memory_space<vmem>>, vector<16x64xf32>
    %cst = arith.constant dense<0.000000e+00> : vector<16x160xf32>
    %8 = tpu.matmul %0, %1, %cst {dimension_numbers = #tpu.dot_dimension_numbers<[1], [0], [0], [1], [0, 0, 1, 1], [], []>} : vector<16x32xf32>, vector<32x160xf32>, vector<16x160xf32> -> vector<16x160xf32>
    %9 = vector.extract_strided_slice %8 {offsets = [0, 0], sizes = [16, 64], strides = [1, 1]} : vector<16x160xf32> to vector<16x64xf32>
    %10 = vector.extract_strided_slice %8 {offsets = [0, 64], sizes = [16, 64], strides = [1, 1]} : vector<16x160xf32> to vector<16x64xf32>
    %11 = vector.extract_strided_slice %8 {offsets = [0, 128], sizes = [16, 32], strides = [1, 1]} : vector<16x160xf32> to vector<16x32xf32>
    %12 = arith.mulf %9, %3 : vector<16x64xf32>
    %13 = arith.mulf %10, %4 : vector<16x64xf32>
    %14 = arith.addf %12, %13 : vector<16x64xf32>
    %15 = arith.mulf %14, %14 : vector<16x64xf32>
    %cst_15 = arith.constant dense<0.000000e+00> : vector<16x64xf32>
    %16 = tpu.matmul %15, %5, %cst_15 {dimension_numbers = #tpu.dot_dimension_numbers<[1], [0], [0], [1], [0, 0, 1, 1], [], []>} : vector<16x64xf32>, vector<64x64xf32>, vector<16x64xf32> -> vector<16x64xf32>
    %17 = vector.extract_strided_slice %14 {offsets = [0, 0], sizes = [16, 32], strides = [1, 1]} : vector<16x64xf32> to vector<16x32xf32>
    %18 = vector.extract_strided_slice %16 {offsets = [0, 0], sizes = [16, 32], strides = [1, 1]} : vector<16x64xf32> to vector<16x32xf32>
    %cst_16 = arith.constant 9.53674316E-7 : f32
    %19 = vector.broadcast %cst_16 : f32 to vector<16x32xf32>
    %20 = arith.addf %18, %19 : vector<16x32xf32>
    %21 = math.rsqrt %20 : vector<16x32xf32>
    %22 = arith.mulf %17, %21 : vector<16x32xf32>
    %23 = vector.extract_strided_slice %14 {offsets = [0, 32], sizes = [16, 32], strides = [1, 1]} : vector<16x64xf32> to vector<16x32xf32>
    %24 = vector.extract_strided_slice %16 {offsets = [0, 32], sizes = [16, 32], strides = [1, 1]} : vector<16x64xf32> to vector<16x32xf32>
    %cst_17 = arith.constant 1.1920929E-7 : f32
    %25 = vector.broadcast %cst_17 : f32 to vector<16x32xf32>
    %26 = arith.addf %24, %25 : vector<16x32xf32>
    %27 = math.rsqrt %26 : vector<16x32xf32>
    %28 = arith.mulf %23, %27 : vector<16x32xf32>
    %29 = vector.extract_strided_slice %6 {offsets = [0, 0], sizes = [64, 32], strides = [1, 1]} : vector<64x64xf32> to vector<64x32xf32>
    %30 = tpu.concatenate %28, %28, %28, %28 in 0 : vector<16x32xf32>, vector<16x32xf32>, vector<16x32xf32>, vector<16x32xf32> -> vector<64x32xf32>
    %31 = arith.mulf %30, %29 : vector<64x32xf32>
    %cst_18 = arith.constant 1.000000e+00 : f32
    %32 = vector.broadcast %cst_18 : f32 to vector<16x32xf32>
    %33 = tpu.concatenate %11, %32 in 1 : vector<16x32xf32>, vector<16x32xf32> -> vector<16x64xf32>
    %34 = tpu.concatenate %33, %33, %33, %33 in 0 : vector<16x64xf32>, vector<16x64xf32>, vector<16x64xf32>, vector<16x64xf32> -> vector<64x64xf32>
    %35 = arith.mulf %34, %6 : vector<64x64xf32>
    %cst_19 = arith.constant dense<0.000000e+00> : vector<16x64xf32>
    %36 = tpu.matmul %22, %31, %cst_19 {dimension_numbers = #tpu.dot_dimension_numbers<[1], [1], [0], [0], [0, 0, 1, 0], [], []>} : vector<16x32xf32>, vector<64x32xf32>, vector<16x64xf32> -> vector<16x64xf32>
    %37 = math.exp %36 : vector<16x64xf32>
    %38 = arith.mulf %37, %7 : vector<16x64xf32>
    %cst_20 = arith.constant dense<0.000000e+00> : vector<16x64xf32>
    %39 = tpu.matmul %38, %35, %cst_20 {dimension_numbers = #tpu.dot_dimension_numbers<[1], [0], [0], [1], [0, 0, 1, 1], [], []>} : vector<16x64xf32>, vector<64x64xf32>, vector<16x64xf32> -> vector<16x64xf32>
    %40 = vector.extract_strided_slice %39 {offsets = [0, 0], sizes = [16, 32], strides = [1, 1]} : vector<16x64xf32> to vector<16x32xf32>
    %41 = vector.extract_strided_slice %39 {offsets = [0, 32], sizes = [16, 32], strides = [1, 1]} : vector<16x64xf32> to vector<16x32xf32>
    %42 = tpu.reciprocal %41 {approx = true} : vector<16x32xf32> -> vector<16x32xf32>
    %43 = arith.mulf %40, %42 : vector<16x32xf32>
    %cst_21 = arith.constant dense<0.000000e+00> : vector<16x32xf32>
    %44 = tpu.matmul %43, %2, %cst_21 {dimension_numbers = #tpu.dot_dimension_numbers<[1], [0], [0], [1], [0, 0, 1, 1], [], []>} : vector<16x32xf32>, vector<32x32xf32>, vector<16x32xf32> -> vector<16x32xf32>
    %c0_22 = arith.constant 0 : index
    %c0_23 = arith.constant 0 : index
    %45 = vector.load %arg9[%c0_22, %c0_23] : memref<16x32xf32, #tpu.memory_space<vmem>>, vector<16x32xf32>
    tpu.vector_store %arg9[%c0_22, %c0_23], %44 {strides = array<i32>} : memref<16x32xf32, #tpu.memory_space<vmem>>, vector<16x32xf32>,
    return
  }
  func.func @transform_0(%arg0: i32) -> (i32, i32) {
    %c0_i32 = arith.constant 0 : i32
    %c0_i32_0 = arith.constant 0 : i32
    %c0_i32_1 = arith.constant 0 : i32
    return %c0_i32, %c0_i32_0 : i32, i32
  }
  func.func @transform_1(%arg0: i32) -> (i32, i32) {
    %c0_i32 = arith.constant 0 : i32
    %c0_i32_0 = arith.constant 0 : i32
    %c0_i32_1 = arith.constant 0 : i32
    return %c0_i32, %c0_i32_0 : i32, i32
  }
  func.func @transform_2(%arg0: i32) -> (i32, i32) {
    %c0_i32 = arith.constant 0 : i32
    %c0_i32_0 = arith.constant 0 : i32
    %c0_i32_1 = arith.constant 0 : i32
    return %c0_i32, %c0_i32_0 : i32, i32
  }
  func.func @transform_3(%arg0: i32) -> (i32, i32) {
    %c0_i32 = arith.constant 0 : i32
    %c0_i32_0 = arith.constant 0 : i32
    %c0_i32_1 = arith.constant 0 : i32
    return %c0_i32, %c0_i32_0 : i32, i32
  }
  func.func @transform_4(%arg0: i32) -> (i32, i32) {
    %c0_i32 = arith.constant 0 : i32
    %c0_i32_0 = arith.constant 0 : i32
    %c0_i32_1 = arith.constant 0 : i32
    return %c0_i32, %c0_i32_0 : i32, i32
  }
  func.func @transform_5(%arg0: i32) -> (i32, i32) {
    %c0_i32 = arith.constant 0 : i32
    %c0_i32_0 = arith.constant 0 : i32
    %c0_i32_1 = arith.constant 0 : i32
    return %c0_i32, %c0_i32_0 : i32, i32
  }
  func.func @transform_6(%arg0: i32) -> (i32, i32) {
    %c0_i32 = arith.constant 0 : i32
    %c0_i32_0 = arith.constant 0 : i32
    %c0_i32_1 = arith.constant 0 : i32
    return %c0_i32, %c0_i32_0 : i32, i32
  }
  func.func @transform_7(%arg0: i32) -> (i32, i32) {
    %c0_i32 = arith.constant 0 : i32
    %c0_i32_0 = arith.constant 0 : i32
    %c0_i32_1 = arith.constant 0 : i32
    return %c0_i32, %c0_i32_0 : i32, i32
  }
  func.func @transform_8(%arg0: i32) -> (i32, i32) {
    %c0_i32 = arith.constant 0 : i32
    %c0_i32_0 = arith.constant 0 : i32
    %c0_i32_1 = arith.constant 0 : i32
    return %c0_i32, %c0_i32_0 : i32, i32
  }
}

</mosaic_0001>

<bundles_post_ra>
// kernel: tpu_custom_call.1
= control target key start
LH: loop header
LB: loop body
LE: loop exit
PB: predicated region body
PF: predicated region fallthrough
CT: control target
= control target key end

     0   :  { %13 = vsyncpa [#allocation3], 0  ;;  %s1261_s0 = inlined_call_operand.hbm [shape: f32[16,32], index: 0, kind: input, shape index: {}]   ;;  %s1262_s1 = inlined_call_operand.hbm [shape: f32[32,160], index: 1, kind: input, shape index: {}]   ;;  %s1263_s2 = inlined_call_operand.hbm [shape: f32[32,32], index: 2, kind: input, shape index: {}]   ;;  %s1264_s3 = inlined_call_operand.hbm [shape: f32[16,64], index: 3, kind: input, shape index: {}]   ;;  %s1265_s4 = inlined_call_operand.hbm [shape: f32[16,64], index: 4, kind: input, shape index: {}]   ;;  %s1266_s5 = inlined_call_operand.hbm [shape: f32[64,64], index: 5, kind: input, shape index: {}]   ;;  %s1267_s6 = inlined_call_operand.hbm [shape: f32[64,64], index: 6, kind: input, shape index: {}]   ;;  %s1268_s7 = inlined_call_operand.hbm [shape: f32[16,64], index: 7, kind: input, shape index: {}]   ;;  %s1269_s8 = inlined_call_operand.hbm [shape: f32[16,32], index: 8, kind: output, shape index: {}]  }
   0x1   :  { %14 = vsyncpa [#allocation6], 0 }
   0x2   :  { %15 = vsyncpa [#allocation9], 0 }
   0x3   :  { %16 = vsyncpa [#allocation12], 0 }
   0x4   :  { %17 = vsyncpa [#allocation15], 0 }
   0x5   :  { %18 = vsyncpa [#allocation4], 0  ;;  %s1098_s27 = smov [#allocation5]  }
   0x6   :  { %s36_s28 = sshll.u32 %s1098_s27, 4  ;;  %s37_s28 = int_to_ptr.vmem [resolvable:$true] %s36_s28 }
   0x7   :  { %s914_s29 = scalar_lea.vmem %s37_s28, 1024  ;;  %p919_p1 = scmp.lt.s32.totalorder %s37_s28, %s37_s28 }
   0x8   :  { %p915_p0 = scmp.ne.s32.totalorder %s37_s28, %s914_s29  ;;  %p920_p2 = scmp.lt.s32.totalorder %s914_s29, %s914_s29 }
   0xa   :  { %p921_p3 = por %p920_p2, %p919_p1 }
   0xc   :  { %p922_p4 = pnand %p921_p3, %p915_p0 }
   0xe   :  { %925 = shalt.err (!%p922_p4)
}
   0xf   :  { %s1099_s30 = smov 256   ;;  %s1100_s9 = smov 16  }
  0x10   :  { %42 = dma.hbm_to_vmem [thread:$0]  %s1262_s1, 1024, %s37_s28, [#allocation6], %s1099_s30, %s1099_s30, %s1100_s9  }
  0x11   :  { %s1101_s12 = smov [#allocation8]   ;;  %s1102_s14 = smov [#allocation11]  }
  0x12   :  { %s60_s13 = sshll.u32 %s1101_s12, 4  ;;  %s84_s15 = sshll.u32 %s1102_s14, 4  ;;  %s61_s13 = int_to_ptr.vmem [resolvable:$true] %s60_s13  ;;  %s85_s15 = int_to_ptr.vmem [resolvable:$true] %s84_s15 }
  0x13   :  { %s934_s16 = scalar_lea.vmem %s61_s13, 256  ;;  %p939_p6 = scmp.lt.s32.totalorder %s61_s13, %s61_s13 }
  0x14   :  { %p935_p5 = scmp.ne.s32.totalorder %s61_s13, %s934_s16  ;;  %p940_p7 = scmp.lt.s32.totalorder %s934_s16, %s934_s16 }
  0x16   :  { %p941_p8 = por %p940_p7, %p939_p6 }
  0x18   :  { %p942_p9 = pnand %p941_p8, %p935_p5 }
  0x1a   :  { %945 = shalt.err (!%p942_p9)
}
  0x1b   :  { %s1103_s17 = smov 128   ;;  %s1104_s18 = smov 8  }
  0x1c   :  { %66 = dma.hbm_to_vmem [thread:$0]  %s1264_s3, 256, %s61_s13, [#allocation9], %s1103_s17, %s1103_s17, %s1104_s18  }
  0x1d   :  { %s954_s1 = scalar_lea.vmem %s85_s15, 1024  ;;  %p959_p11 = scmp.lt.s32.totalorder %s85_s15, %s85_s15 }
  0x1e   :  { %p955_p10 = scmp.ne.s32.totalorder %s85_s15, %s954_s1  ;;  %p960_p12 = scmp.lt.s32.totalorder %s954_s1, %s954_s1 }
  0x20   :  { %p961_p13 = por %p960_p12, %p959_p11 }
  0x22   :  { %p962_p0 = pnand %p961_p13, %p955_p10 }
  0x24   :  { %965 = shalt.err (!%p962_p0)
}
  0x25   :  { %90 = dma.hbm_to_vmem [thread:$0]  %s1266_s5, 1024, %s85_s15, [#allocation12], %s1103_s17, %s1103_s17, %s1104_s18  }
  0x26   :  { %s1105_s23 = smov [#allocation2]   ;;  %s1106_s25 = smov [#allocation7]  }
  0x27   :  { %s24_s24 = sshll.u32 %s1105_s23, 4  ;;  %s48_s3 = sshll.u32 %s1106_s25, 4  ;;  %s25_s24 = int_to_ptr.vmem [resolvable:$true] %s24_s24  ;;  %s49_s3 = int_to_ptr.vmem [resolvable:$true] %s48_s3 }
  0x28   :  { %s974_s26 = scalar_lea.vmem %s25_s24, 256  ;;  %p979_p2 = scmp.lt.s32.totalorder %s25_s24, %s25_s24 }
  0x29   :  { %p975_p1 = scmp.ne.s32.totalorder %s25_s24, %s974_s26  ;;  %p980_p3 = scmp.lt.s32.totalorder %s974_s26, %s974_s26 }
  0x2b   :  { %p981_p4 = por %p980_p3, %p979_p2 }
  0x2d   :  { %p982_p5 = pnand %p981_p4, %p975_p1 }
  0x2f   :  { %985 = shalt.err (!%p982_p5)
}
  0x30   :  { %30 = dma.hbm_to_vmem [thread:$0]  %s1261_s0, 256, %s25_s24, [#allocation3], %s1103_s17, %s1103_s17, %s1104_s18  }
  0x31   :  { %s994_s5 = scalar_lea.vmem %s49_s3, 512  ;;  %p999_p7 = scmp.lt.s32.totalorder %s49_s3, %s49_s3 }
  0x32   :  { %p995_p6 = scmp.ne.s32.totalorder %s49_s3, %s994_s5  ;;  %p1000_p8 = scmp.lt.s32.totalorder %s994_s5, %s994_s5 }
  0x34   :  { %p1001_p9 = por %p1000_p8, %p999_p7 }
  0x36   :  { %p1002_p10 = pnand %p1001_p9, %p995_p6 }
  0x38   :  { %1005 = shalt.err (!%p1002_p10)
}
  0x39   :  { %54 = dma.hbm_to_vmem [thread:$0]  %s1263_s2, 512, %s49_s3, [#allocation6], %s1103_s17, %s1103_s17, %s1104_s18  }
  0x3a   :  { %s1107_s9 = smov [#allocation10]   ;;  %s1108_s11 = smov [#allocation13]  }
  0x3b   :  { %s72_s10 = sshll.u32 %s1107_s9, 4  ;;  %s96_s0 = sshll.u32 %s1108_s11, 4  ;;  %s73_s10 = int_to_ptr.vmem [resolvable:$true] %s72_s10  ;;  %s97_s0 = int_to_ptr.vmem [resolvable:$true] %s96_s0 }
  0x3c   :  { %s1014_s12 = scalar_lea.vmem %s73_s10, 256  ;;  %p1019_p12 = scmp.lt.s32.totalorder %s73_s10, %s73_s10 }
  0x3d   :  { %p1015_p11 = scmp.ne.s32.totalorder %s73_s10, %s1014_s12  ;;  %p1020_p13 = scmp.lt.s32.totalorder %s1014_s12, %s1014_s12 }
  0x3f   :  { %p1021_p0 = por %p1020_p13, %p1019_p12 }
  0x41   :  { %p1022_p1 = pnand %p1021_p0, %p1015_p11 }
  0x43   :  { %1025 = shalt.err (!%p1022_p1)
}
  0x44   :  { %78 = dma.hbm_to_vmem [thread:$0]  %s1265_s4, 256, %s73_s10, [#allocation9], %s1103_s17, %s1103_s17, %s1104_s18  }
  0x45   :  { %s1034_s2 = scalar_lea.vmem %s97_s0, 1024  ;;  %p1039_p3 = scmp.lt.s32.totalorder %s97_s0, %s97_s0 }
  0x46   :  { %p1035_p2 = scmp.ne.s32.totalorder %s97_s0, %s1034_s2  ;;  %p1040_p4 = scmp.lt.s32.totalorder %s1034_s2, %s1034_s2 }
  0x48   :  { %p1041_p5 = por %p1040_p4, %p1039_p3 }
  0x4a   :  { %p1042_p6 = pnand %p1041_p5, %p1035_p2 }
  0x4c   :  { %1045 = shalt.err (!%p1042_p6)
}
  0x4d   :  { %102 = dma.hbm_to_vmem [thread:$0]  %s1267_s6, 1024, %s97_s0, [#allocation12], %s1103_s17, %s1103_s17, %s1104_s18  }
  0x4e   :  { %s1109_s19 = smov [#allocation14]  }
  0x4f   :  { %s108_s20 = sshll.u32 %s1109_s19, 4  ;;  %s109_s20 = int_to_ptr.vmem [resolvable:$true] %s108_s20 }
  0x50   :  { %s1054_s1 = scalar_lea.vmem %s109_s20, 256  ;;  %p1059_p8 = scmp.lt.s32.totalorder %s109_s20, %s109_s20 }
  0x51   :  { %p1055_p7 = scmp.ne.s32.totalorder %s109_s20, %s1054_s1  ;;  %p1060_p9 = scmp.lt.s32.totalorder %s1054_s1, %s1054_s1 }
  0x53   :  { %p1061_p10 = por %p1060_p9, %p1059_p8 }
  0x55   :  { %p1062_p11 = pnand %p1061_p10, %p1055_p7 }
  0x57   :  { %1065 = shalt.err (!%p1062_p11)
}
  0x58   :  { %114 = dma.hbm_to_vmem [thread:$0]  %s1268_s7, 256, %s109_s20, [#allocation15], %s1103_s17, %s1103_s17, %s1104_s18  }
  0x59   :  { %1086 = dma.done.wait [#allocation3], 256  }
  0x5a   :  { %1087 = vsyncadd [#allocation3], 4294967040 }
  0x5b   :  { %1088 = dma.done.wait [#allocation6], 1536  }
  0x5c   :  { %1089 = vsyncadd [#allocation6], 4294965760 }
  0x5d   :  { %1090 = dma.done.wait [#allocation9], 512  }
  0x5e   :  { %1091 = vsyncadd [#allocation9], 4294966784 }
  0x5f   :  { %1092 = dma.done.wait [#allocation12], 2048  }
  0x60   :  { %1093 = vsyncadd [#allocation12], 4294965248 }
  0x61   :  { %1094 = dma.done.wait [#allocation15], 256  }
  0x62   :  { %1095 = vsyncadd [#allocation15], 4294967040  ;;  %v1110_v0 = vmov 0.0   ;;  %v148_v1 = vld [vmem:[#allocation5 + $0x38] sm:$0xff]  ;;  %v147_v2 = vld [vmem:[#allocation5 + $0x30] sm:$0xff]  ;;  %s1111_s6 = smov 64  }
  0x63   :  { %246 = vmatprep.mubr.f32.mxu0 %v1110_v0  ;;  %v146_v3 = vld [vmem:[#allocation5 + $0x28] sm:$0xff]  ;;  %206 = vmatprep.subr.mxu0 %v148_v1  ;;  %v145_v4 = vld [vmem:[#allocation5 + $0x20] sm:$0xff]  ;;  %v144_v5 = vld [vmem:[#allocation5 + $0x18] sm:$0xff]  ;;  %vm175_vm0 = vcmask 261120   ;;  %s1112_s7 = smov 32   ;;  %vm283_vm1 = vcmask 523264  }
  0x64   :  { %207 = vmatpush1.msra.mxu0 %v147_v2  ;;  %v143_v6 = vld [vmem:[#allocation5 + $0x10] sm:$0xff]  ;;  %v142_v8 = vld [vmem:[#allocation5 + $0x8] sm:$0xff]  ;;  %v164_v9 = vld [vmem:[#allocation11 + $0x38] sm:$0xff]  ;;  %s1113_s22 = smov 96   ;;  %s1114_s23 = smov [#allocation16]  }
  0x65   :  { %208 = vmatprep.subr.mxu0 %v146_v3  ;;  %v155_v7 = vld [vmem:[#allocation10] sm:$0xff]  ;;  %v141_v11 = vld [vmem:[#allocation5] sm:$0xff]  ;;  %v156_v12 = vld [vmem:[#allocation10 + $0x8] sm:$0xff]  ;;  %805 = vmatprep.subr.mxu1 %v164_v9  ;;  %s735_s24 = sshll.u32 %s1114_s23, 4  ;;  %s736_s24 = int_to_ptr.vmem [resolvable:$true] %s735_s24 }
  0x66   :  { %209 = vmatpush1.msra.mxu0 %v145_v4  ;;  %263 = vrot.lane.b32.xlu0 %v155_v7, %s1111_s6  ;;  %v163_v10 = vld [vmem:[#allocation11 + $0x30] sm:$0xff]  ;;  %v162_v14 = vld [vmem:[#allocation11 + $0x28] sm:$0xff]  ;;  %v161_v15 = vld [vmem:[#allocation11 + $0x20] sm:$0xff]  ;;  %s1066_s25 = scalar_lea.vmem %s736_s24, 256  ;;  %p1071_p13 = scmp.lt.s32.totalorder %s736_s24, %s736_s24 }
  0x67   :  { %210 = vmatprep.subr.mxu0 %v144_v5  ;;  %v139_v13 = vld [vmem:[#allocation2] sm:$0xff]  ;;  %806 = vmatpush3.msra.mxu1 %v164_v9  ;;  %v140_v16 = vld [vmem:[#allocation2 + $0x8] sm:$0xff]  ;;  %v158_v19 = vld [vmem:[#allocation11 + $0x8] sm:$0xff]  ;;  %p1067_p12 = scmp.ne.s32.totalorder %s736_s24, %s1066_s25  ;;  %p1072_p0 = scmp.lt.s32.totalorder %s1066_s25, %s1066_s25 }
  0x68   :  { %211 = vmatpush1.msra.mxu0 %v143_v6  ;;  %807 = vmatprep.subr.mxu1 %v163_v10  ;;  %v160_v17 = vld [vmem:[#allocation11 + $0x18] sm:$0xff]  ;;  %v159_v18 = vld [vmem:[#allocation11 + $0x10] sm:$0xff]  ;;  %v157_v20 = vld [vmem:[#allocation11] sm:$0xff] }
  0x69   :  { %212 = vmatprep.subr.mxu0 %v142_v8  ;;  %808 = vmatpush3.msra.mxu1 %v163_v10  ;;  %v171_v23 = vld [vmem:[#allocation13 + $0x30] sm:$0xff]  ;;  %v169_v25 = vld [vmem:[#allocation13 + $0x20] sm:$0xff]  ;;  %v172_v32 = vld [vmem:[#allocation13 + $0x38] sm:$0xff]  ;;  %p1073_p1 = por %p1072_p0, %p1071_p13 }
  0x6a   :  { %213 = vmatpush1.msra.mxu0 %v141_v11  ;;  %265 = vrot.lane.b32.xlu0 %v156_v12, %s1111_s6  ;;  %v167_v26 = vld [vmem:[#allocation13 + $0x10] sm:$0xff]  ;;  %v165_v27 = vld [vmem:[#allocation13] sm:$0xff]  ;;  %v170_v38 = vld [vmem:[#allocation13 + $0x28] sm:$0xff] }
  0x6b   :  { %751 = vmatmul.mubr.msk.f32.vlgmr.msra.gmra.mxu0 %vm175_vm0, %v139_v13  ;;  %809 = vmatprep.subr.mxu1 %v162_v14  ;;  %v168_v39 = vld [vmem:[#allocation13 + $0x18] sm:$0xff]  ;;  %v166_v40 = vld [vmem:[#allocation13 + $0x8] sm:$0xff]  ;;  %v153_v47 = vld [vmem:[#allocation8] sm:$0xff]  ;;  %p1074_p2 = pnand %p1073_p1, %p1067_p12 }
  0x6c   :  { %252 = vmatprep.mubr.f32.mxu0 %v1110_v0  ;;  %810 = vmatpush3.msra.mxu1 %v162_v14  ;;  %v154_v49 = vld [vmem:[#allocation8 + $0x8] sm:$0xff] }
  0x6d   :  { %811 = vmatprep.subr.mxu1 %v161_v15 }
  0x6e   :  { %812 = vmatpush3.msra.mxu1 %v161_v15  ;;  %399 = vrot.lane.b32.xlu0 %v172_v32, %s1112_s7 }
  0x6f   :  { %752 = vmatmul.mubr.msk.f32.gmra.mxu0 %vm175_vm0, %v140_v16  ;;  %813 = vmatprep.subr.mxu1 %v160_v17 }
  0x70   :  { %814 = vmatpush3.msra.mxu1 %v160_v17 }
  0x71   :  { %815 = vmatprep.subr.mxu1 %v159_v18 }
  0x72   :  { %816 = vmatpush3.msra.mxu1 %v159_v18  ;;  %395 = vrot.lane.b32.xlu0 %v170_v38, %s1112_s7 }
  0x73   :  { %817 = vmatprep.subr.mxu1 %v158_v19 }
  0x74   :  { %818 = vmatpush3.msra.mxu1 %v158_v19 }
  0x75   :  { %819 = vmatprep.subr.mxu1 %v157_v20 }
  0x76   :  { %820 = vmatpush3.msra.mxu1 %v157_v20  ;;  %391 = vrot.lane.b32.xlu0 %v168_v39, %s1112_s7 }
  0x7a   :  { %387 = vrot.lane.b32.xlu0 %v166_v40, %s1112_s7 }
  0xd8   :  { %v264_v21 = vpop.permute.xlu0 %263 }
  0xdc   :  { %v266_v29 = vpop.permute.xlu0 %265 }
  0xe0   :  { %v400_v62 = vpop.permute.xlu0 %399 }
  0xe4   :  { %v396_v1 = vpop.permute.xlu0 %395 }
  0xe8   :  { %v392_v10 = vpop.permute.xlu0 %391 }
  0xec   :  { %v388_v15 = vpop.permute.xlu0 %387 }
 0x12b   :  { %v248_v22 = vpop.f32.mrf.mxu0 }
 0x12c   :  { %v269_v24 = vmul.f32 %v264_v21, %v248_v22  ;;  %v259_v48 = vmul.f32 %v248_v22, %v153_v47 }
 0x12d   :  { %v250_v28 = vpop.f32.mrf.mxu0 }
 0x12e   :  { %v417_v30 = vsel %vm175_vm0, %v250_v28, 1.0  ;;  %273 = vrot.lane.b32.xlu1 %v269_v24, %s1111_s6 }
 0x12f   :  { %v254_v31 = vpop.f32.mrf.mxu0  ;;  %v425_v33 = vmul.f32 %v417_v30, %v171_v23  ;;  %v423_v34 = vmul.f32 %v417_v30, %v169_v25  ;;  %v421_v35 = vmul.f32 %v417_v30, %v167_v26  ;;  %v419_v36 = vmul.f32 %v417_v30, %v165_v27 }
 0x130   :  { %v270_v37 = vmul.f32 %v266_v29, %v254_v31  ;;  %v260_v52 = vmul.f32 %v254_v31, %v154_v49 }
 0x131   :  { %v256_v41 = vpop.f32.mrf.mxu0 }
 0x132   :  { %v418_v42 = vsel %vm175_vm0, %v256_v41, 1.0  ;;  %275 = vrot.lane.b32.xlu1 %v270_v37, %s1111_s6  ;;  %v174_v37 = vld [vmem:[#allocation14 + $0x8] sm:$0xff]  ;;  %v152_v41 = vld [vmem:[#allocation7 + $0x18] sm:$0xff] }
 0x133   :  { %v426_v43 = vmul.f32 %v418_v42, %v172_v32  ;;  %v424_v44 = vmul.f32 %v418_v42, %v170_v38  ;;  %v422_v45 = vmul.f32 %v418_v42, %v168_v39  ;;  %v420_v46 = vmul.f32 %v418_v42, %v166_v40  ;;  %v151_v42 = vld [vmem:[#allocation7 + $0x10] sm:$0xff] }
 0x135   :  { %843 = vmatprep.subr.mxu1 %v426_v43 }
 0x136   :  { %397 = vrot.lane.b32.xlu1 %v171_v23, %s1112_s7 }
 0x13a   :  { %393 = vrot.lane.b32.xlu1 %v169_v25, %s1112_s7 }
 0x13e   :  { %389 = vrot.lane.b32.xlu1 %v167_v26, %s1112_s7 }
 0x142   :  { %385 = vrot.lane.b32.xlu1 %v165_v27, %s1112_s7 }
 0x1a0   :  { %v274_v50 = vpop.permute.xlu1 %273 }
 0x1a1   :  { %v279_v51 = vadd.f32 %v274_v50, %v259_v48 }
 0x1a3   :  { %v281_v53 = vmul.f32 %v279_v51, %v279_v51 }
 0x1a4   :  { %v276_v54 = vpop.permute.xlu1 %275 }
 0x1a5   :  { %v1213_v55 = vadd.f32 %v276_v54, %v260_v52  ;;  %821 = vmatprep.mubr.msk.f32.mxu1 %vm283_vm1, %v281_v53 }
 0x1a7   :  { %v282_v56 = vmul.f32 %v1213_v55, %v1213_v55 }
 0x1a8   :  { %v398_v63 = vpop.permute.xlu1 %397 }
 0x1a9   :  { %822 = vmatmul.mubr.msk.f32.vlgmr.msra.gmra.mxu1 %vm283_vm1, %v282_v56 }
 0x1aa   :  { %844 = vmatpush3.msra.mxu1 %v426_v43 }
 0x1ab   :  { %845 = vmatprep.subr.mxu1 %v425_v33 }
 0x1ac   :  { %846 = vmatpush3.msra.mxu1 %v425_v33  ;;  %v394_v5 = vpop.permute.xlu1 %393 }
 0x1ad   :  { %847 = vmatprep.subr.mxu1 %v424_v44 }
 0x1ae   :  { %848 = vmatpush3.msra.mxu1 %v424_v44 }
 0x1af   :  { %849 = vmatprep.subr.mxu1 %v423_v34 }
 0x1b0   :  { %850 = vmatpush3.msra.mxu1 %v423_v34  ;;  %v390_v12 = vpop.permute.xlu1 %389 }
 0x1b1   :  { %851 = vmatprep.subr.mxu1 %v422_v45 }
 0x1b2   :  { %852 = vmatpush3.msra.mxu1 %v422_v45  ;;  %v150_v45 = vld [vmem:[#allocation7 + $0x8] sm:$0xff] }
 0x1b3   :  { %853 = vmatprep.subr.mxu1 %v421_v35 }
 0x1b4   :  { %854 = vmatpush3.msra.mxu1 %v421_v35  ;;  %v386_v17 = vpop.permute.xlu1 %385  ;;  %v173_v35 = vld [vmem:[#allocation14] sm:$0xff] }
 0x1b5   :  { %855 = vmatprep.subr.mxu1 %v420_v46 }
 0x1b6   :  { %856 = vmatpush3.msra.mxu1 %v420_v46  ;;  %v149_v46 = vld [vmem:[#allocation7] sm:$0xff] }
 0x1b7   :  { %857 = vmatprep.subr.mxu1 %v419_v36 }
 0x1b8   :  { %858 = vmatpush3.msra.mxu1 %v419_v36 }
 0x1b9   :  { %862 = vmatprep.subr.mxu1 %v152_v41 }
 0x269   :  { %v823_v57 = vpop.f32.mrf.mxu1 }
 0x26a   :  { %v372_v58 = vadd.f32 1.1920929e-07, %v823_v57  ;;  %v366_v24 = vadd.f32 9.536743e-07, %v823_v57 }
 0x26b   :  { %v356_v59 = vpop.f32.mrf.mxu1 }
 0x26c   :  { %v365_v60 = vadd.f32 9.536743e-07, %v356_v59  ;;  %v371_v61 = vadd.f32 1.1920929e-07, %v356_v59  ;;  %890 = vrsqrt.f32 %v372_v58 }
 0x26e   :  { %892 = vrsqrt.f32 %v365_v60 }
 0x26f   :  { %894 = vrsqrt.f32 %v371_v61 }
 0x270   :  { %896 = vrsqrt.f32 %v366_v24 }
 0x279   :  { %v891_v0 = vpop.eup %890 }
 0x27a   :  { %v376_v3 = vmul.f32 %v891_v0, %v1213_v55 }
 0x27b   :  { %v893_v2 = vpop.eup %892 }
 0x27c   :  { %v895_v4 = vpop.eup %894  ;;  %v369_v6 = vmul.f32 %v893_v2, %v279_v51  ;;  %v416_v7 = vmul.f32 %v400_v62, %v376_v3  ;;  %v414_v11 = vmul.f32 %v396_v1, %v376_v3  ;;  %v412_v14 = vmul.f32 %v392_v10, %v376_v3 }
 0x27d   :  { %v375_v8 = vmul.f32 %v895_v4, %v279_v51  ;;  %v410_v18 = vmul.f32 %v388_v15, %v376_v3  ;;  %v897_v29 = vpop.eup %896 }
 0x27e   :  { %840 = vmatprep.mubr.msk.f32.mxu0 %vm175_vm0, %v369_v6  ;;  %449 = vrot.lane.b32.xlu0 %v416_v7, %s1113_s22  ;;  %v370_v30 = vmul.f32 %v897_v29, %v1213_v55 }
 0x27f   :  { %v415_v9 = vmul.f32 %v398_v63, %v375_v8  ;;  %v413_v13 = vmul.f32 %v394_v5, %v375_v8  ;;  %v411_v16 = vmul.f32 %v390_v12, %v375_v8  ;;  %v409_v19 = vmul.f32 %v386_v17, %v375_v8 }
 0x281   :  { %447 = vrot.lane.b32.xlu1 %v415_v9, %s1113_s22 }
 0x282   :  { %445 = vrot.lane.b32.xlu0 %v414_v11, %s1113_s22 }
 0x285   :  { %443 = vrot.lane.b32.xlu1 %v413_v13, %s1113_s22 }
 0x286   :  { %441 = vrot.lane.b32.xlu0 %v412_v14, %s1113_s22 }
 0x289   :  { %439 = vrot.lane.b32.xlu1 %v411_v16, %s1113_s22 }
 0x28a   :  { %437 = vrot.lane.b32.xlu0 %v410_v18, %s1113_s22 }
 0x28d   :  { %435 = vrot.lane.b32.xlu1 %v409_v19, %s1113_s22 }
 0x2f0   :  { %v450_v20 = vpop.permute.xlu0 %449 }
 0x2f1   :  { %824 = vmatprep.subr.msk.mxu0 %vm175_vm0, %v450_v20 }
 0x2f2   :  { %825 = vmatpush3.xpose.msk.msra.mxu0 %vm175_vm0, %v450_v20 }
 0x2f3   :  { %v448_v21 = vpop.permute.xlu1 %447 }
 0x2f4   :  { %826 = vmatprep.subr.msk.mxu0 %vm175_vm0, %v448_v21  ;;  %v446_v22 = vpop.permute.xlu0 %445 }
 0x2f6   :  { %827 = vmatpush3.xpose.msk.msra.mxu0 %vm175_vm0, %v448_v21 }
 0x2f7   :  { %828 = vmatprep.subr.msk.mxu0 %vm175_vm0, %v446_v22  ;;  %v444_v23 = vpop.permute.xlu1 %443 }
 0x2f8   :  { %v442_v25 = vpop.permute.xlu0 %441 }
 0x2fa   :  { %829 = vmatpush3.xpose.msk.msra.mxu0 %vm175_vm0, %v446_v22 }
 0x2fb   :  { %830 = vmatprep.subr.msk.mxu0 %vm175_vm0, %v444_v23  ;;  %v440_v26 = vpop.permute.xlu1 %439 }
 0x2fc   :  { %v438_v27 = vpop.permute.xlu0 %437 }
 0x2fe   :  { %831 = vmatpush3.xpose.msk.msra.mxu0 %vm175_vm0, %v444_v23 }
 0x2ff   :  { %832 = vmatprep.subr.msk.mxu0 %vm175_vm0, %v442_v25  ;;  %v436_v28 = vpop.permute.xlu1 %435 }
 0x302   :  { %833 = vmatpush3.xpose.msk.msra.mxu0 %vm175_vm0, %v442_v25 }
 0x303   :  { %834 = vmatprep.subr.msk.mxu0 %vm175_vm0, %v440_v26 }
 0x306   :  { %835 = vmatpush3.xpose.msk.msra.mxu0 %vm175_vm0, %v440_v26 }
 0x307   :  { %836 = vmatprep.subr.msk.mxu0 %vm175_vm0, %v438_v27 }
 0x30a   :  { %837 = vmatpush3.xpose.msk.msra.mxu0 %vm175_vm0, %v438_v27 }
 0x30b   :  { %838 = vmatprep.subr.msk.mxu0 %vm175_vm0, %v436_v28 }
 0x30e   :  { %839 = vmatpush3.xpose.msk.msra.mxu0 %vm175_vm0, %v436_v28 }
 0x311   :  { %841 = vmatmul.mubr.msk.f32.vlgmr.msra.gmra.mxu0 %vm175_vm0, %v370_v30 }
 0x3d1   :  { %v842_v31 = vpop.f32.mrf.mxu0 }
 0x3d2   :  { %v550_v32 = vmul.f32 1.442695, %v842_v31 }
 0x3d3   :  { %v539_v33 = vpop.f32.mrf.mxu0 }
 0x3d4   :  { %v548_v34 = vmul.f32 1.442695, %v539_v33  ;;  %898 = vpow2.f32 %v550_v32 }
 0x3d6   :  { %900 = vpow2.f32 %v548_v34 }
 0x3e1   :  { %v899_v36 = vpop.eup %898 }
 0x3e2   :  { %v553_v40 = vmul.f32 %v899_v36, %v174_v37 }
 0x3e3   :  { %v901_v38 = vpop.eup %900 }
 0x3e4   :  { %v552_v39 = vmul.f32 %v901_v38, %v173_v35 }
 0x3e6   :  { %859 = vmatprep.mubr.msk.f32.mxu1 %vm283_vm1, %v552_v39 }
 0x3e7   :  { %860 = vmatmul.mubr.msk.f32.vlgmr.msra.gmra.mxu1 %vm283_vm1, %v553_v40 }
 0x3e8   :  { %863 = vmatpush3.msra.mxu1 %v152_v41 }
 0x3e9   :  { %864 = vmatprep.subr.mxu1 %v151_v42 }
 0x3ea   :  { %865 = vmatpush3.msra.mxu1 %v151_v42 }
 0x3eb   :  { %866 = vmatprep.subr.mxu1 %v150_v45 }
 0x3ec   :  { %867 = vmatpush3.msra.mxu1 %v150_v45 }
 0x3ed   :  { %868 = vmatprep.subr.mxu1 %v149_v46 }
 0x3ee   :  { %869 = vmatpush3.msra.mxu1 %v149_v46 }
 0x4a7   :  { %v861_v43 = vpop.f32.mrf.mxu1 }
 0x4a8   :  { %902 = vrcp.f32 %v861_v43 }
 0x4a9   :  { %v626_v44 = vpop.f32.mrf.mxu1 }
 0x4aa   :  { %904 = vrcp.f32 %v626_v44 }
 0x4b5   :  { %v903_v47 = vpop.eup %902 }
 0x4b6   :  { %641 = vrot.lane.b32.xlu1 %v903_v47, %s1113_s22 }
 0x4b7   :  { %v905_v48 = vpop.eup %904 }
 0x4b8   :  { %639 = vrot.lane.b32.xlu0 %v905_v48, %s1113_s22 }
 0x528   :  { %v642_v49 = vpop.permute.xlu1 %641 }
 0x529   :  { %v646_v52 = vmul.f32 %v861_v43, %v642_v49 }
 0x52a   :  { %v640_v50 = vpop.permute.xlu0 %639 }
 0x52b   :  { %v645_v51 = vmul.f32 %v640_v50, %v626_v44 }
 0x52d   :  { %870 = vmatprep.mubr.msk.f32.mxu1 %vm175_vm0, %v645_v51 }
 0x52e   :  { %871 = vmatmul.mubr.msk.f32.vlgmr.msra.gmra.mxu1 %vm175_vm0, %v646_v52 }
 0x5ee   :  { %v872_v53 = vpop.f32.mrf.mxu1 }
 0x5ef   :  { %729 = vst.msk [vmem:[#allocation16 + $0x8] sm:$0xff] %vm175_vm0, %v872_v53 }
 0x5f0   :  { %v719_v54 = vpop.f32.mrf.mxu1 }
 0x5f1   :  { %728 = vst.msk [vmem:[#allocation16] sm:$0xff] %vm175_vm0, %v719_v54 }
 0x5f2   :  { %1077 = shalt.err (!%p1074_p2)
}
 0x5f3   :  { %741 = dma.vmem_to_hbm [thread:$0]  %s736_s24, 256, %s1269_s8, [#allocation4], %s1103_s17, %s1103_s17, %s1104_s18  }
 0x5f4   :  { %1096 = dma.done.wait [#allocation4], 256  }
 0x5f5   :  { %1097 = vsyncadd [#allocation4], 4294967040 }
 0x5f6   :  { %745 = vsyncpa [#allocation3], 1 }
 0x5f7   :  { %746 = vsyncpa [#allocation6], 1 }
 0x5f8   :  { %747 = vsyncpa [#allocation9], 1 }
 0x5f9   :  { %748 = vsyncpa [#allocation12], 1 }
 0x5fa   :  { %749 = vsyncpa [#allocation15], 1 }
 0x5fb   :  { %750 = vsyncpa [#allocation4], 1 }

</bundles_post_ra>
